<compile_context>
chip_gen: v7x
topology: tpu7x:2x2x1
jax: 0.10.0
libtpu: 0.0.40
codegen_flags: <defaults>
</compile_context>

<pallas_src>
import jax
import jax.numpy as jnp
from jax.experimental import pallas as pl
from jax.experimental.pallas import tpu as pltpu


def _relu_kernel(x_ref, o_ref):
    # Elementwise max(x, 0) on the whole VMEM tile (pure VPU work).
    o_ref[...] = jnp.maximum(x_ref[...], jnp.zeros((), x_ref.dtype))


# Per-buffer VMEM cap for one block on the multi-step fallback path.
# 3 MiB in + 3 MiB out, double buffered = 12 MiB -> fits v5e's 16 MiB scoped
# default with headroom, and is comfortable on v6e/v7x's 32 MiB default.
_MAX_BLOCK_BYTES = 3 * 1024 * 1024

# Candidate lane-dense widths (multiples of 128), widest first.
_COL_CANDIDATES = (16384, 8192, 4096, 2048, 1024, 512, 384, 256, 128)


def _sublane_pack(dtype) -> int:
    # Rows-per-vreg packing: 8 for 32-bit, 16 for 16-bit, 32 for 8-bit dtypes.
    itemsize = jnp.dtype(dtype).itemsize
    return max(1, 4 // itemsize) * 8


@jax.jit
def relu_pallas(x: jax.Array) -> jax.Array:
    """ReLU via a Pallas TPU kernel; matches torch.nn.ReLU(inplace=True) math."""
    orig_shape = x.shape
    dtype = x.dtype
    total = x.size
    itemsize = jnp.dtype(dtype).itemsize
    pack = _sublane_pack(dtype)

    # Prefer the widest lane-dense last dim whose row count is also a multiple
    # of the sublane pack (fully dense vregs, unmasked vld/vst).
    cols = None
    for cand in _COL_CANDIDATES:
        if total % cand == 0 and (total // cand) % pack == 0:
            cols = cand
            break
    if cols is None:
        # Accept a ragged sublane tail rather than give up on lane density.
        for cand in _COL_CANDIDATES:
            if total % cand == 0:
                cols = cand
                break
    if cols is None:
        # TODO(synk): pad-to-multiple-of-128 path for odd element counts; not
        # needed for this module's shape. XLA fuses this elementwise op fine.
        return jnp.maximum(x, jnp.zeros((), dtype))

    rows = total // cols
    x2d = x.reshape(rows, cols)
    row_bytes = cols * itemsize

    if rows * row_bytes <= _MAX_BLOCK_BYTES:
        # Whole tensor in one block: zero grid-step overhead. This path is
        # taken for the module's (392, 256) f32 activation (~392 KiB).
        tile_rows = rows
        grid = (1,)
    else:
        # Largest pack-aligned row tile under the per-buffer cap, but keep at
        # least ~4 blocks so the "parallel" axis shards across both v7x TCs.
        cap_rows = max(pack, (_MAX_BLOCK_BYTES // row_bytes) // pack * pack)
        quarter_rows = max(pack, (-(-rows // 4) + pack - 1) // pack * pack)
        tile_rows = min(cap_rows, quarter_rows)
        grid = (pl.cdiv(rows, tile_rows),)

    out2d = pl.pallas_call(
        _relu_kernel,
        out_shape=jax.ShapeDtypeStruct((rows, cols), dtype),
        grid=grid,
        in_specs=[pl.BlockSpec((tile_rows, cols), lambda i: (i, 0))],
        out_specs=pl.BlockSpec((tile_rows, cols), lambda i: (i, 0)),
        compiler_params=pltpu.CompilerParams(
            dimension_semantics=("parallel",),
        ),
        cost_estimate=pl.CostEstimate(
            flops=total,
            transcendentals=0,
            bytes_accessed=2 * total * itemsize,
        ),
    )(x2d)

    return out2d.reshape(orig_shape)


if __name__ == "__main__":
    key = jax.random.PRNGKey(0)
    # Shape the module's forward implies: [1, 128, 28, 28] (NCHW), ~392 KiB f32.
    x26 = jax.random.normal(key, (1, 128, 28, 28), dtype=jnp.float32)

    ref = jnp.maximum(x26, 0.0)

    x27 = relu_pallas(x26)
    jax.block_until_ready(x27)

    assert x27.shape == x26.shape
    assert x27.dtype == x26.dtype
    assert jnp.allclose(x27, ref), "mismatch vs reference ReLU"

    print("KERNEL_OK")
</pallas_src>

<mosaic_0001>
module attributes {stable_mosaic.version = 11 : i64} {
  func.func @_relu_kernel(%arg0: i32, %arg1: memref<392x256xf32, #tpu.memory_space<vmem>>, %arg2: memref<392x256xf32, #tpu.memory_space<vmem>>) attributes {dimension_semantics = [#tpu.dimension_semantics<parallel>], iteration_bounds = array<i64: 1>, scalar_prefetch = 0 : i64, scratch_operands = 0 : i64, tpu.core_type = #tpu.core_type<tc>, window_params = [{transform_indices = @transform_0, window_bounds = array<i64: 392, 256>}, {transform_indices = @transform_1, window_bounds = array<i64: 392, 256>}]} {
    %c0 = arith.constant 0 : index
    %c0_0 = arith.constant 0 : index
    %0 = vector.load %arg1[%c0, %c0_0] : memref<392x256xf32, #tpu.memory_space<vmem>>, vector<392x256xf32>
    %cst = arith.constant 0.000000e+00 : f32
    %1 = vector.broadcast %cst : f32 to vector<392x256xf32>
    %2 = arith.maximumf %0, %1 : vector<392x256xf32>
    %c0_1 = arith.constant 0 : index
    %c0_2 = arith.constant 0 : index
    %3 = vector.load %arg2[%c0_1, %c0_2] : memref<392x256xf32, #tpu.memory_space<vmem>>, vector<392x256xf32>
    tpu.vector_store %arg2[%c0_1, %c0_2], %2 {strides = array<i32>} : memref<392x256xf32, #tpu.memory_space<vmem>>, vector<392x256xf32>,
    return
  }
  func.func @transform_0(%arg0: i32) -> (i32, i32) {
    %c0_i32 = arith.constant 0 : i32
    %c0_i32_0 = arith.constant 0 : i32
    return %arg0, %c0_i32 : i32, i32
  }
  func.func @transform_1(%arg0: i32) -> (i32, i32) {
    %c0_i32 = arith.constant 0 : i32
    %c0_i32_0 = arith.constant 0 : i32
    return %arg0, %c0_i32 : i32, i32
  }
}

</mosaic_0001>

<bundles_post_ra>
// kernel: relu_pallas.1
= control target key start
LH: loop header
LB: loop body
LE: loop exit
PB: predicated region body
PF: predicated region fallthrough
CT: control target
= control target key end

     0   :  { %s904_s0 = inlined_call_operand.vmem [shape: f32[392,256], index: 0, kind: input, shape index: {}]   ;;  %s905_s1 = inlined_call_operand.vmem [shape: f32[392,256], index: 1, kind: output, shape index: {}]  }
   0x1   :  { %v8_v0 = vld [vmem:[%s904_s0] sm:$0xff]  ;;  %v9_v1 = vld [vmem:[%s904_s0 + $0x8] sm:$0xff]  ;;  %v10_v2 = vld [vmem:[%s904_s0 + $0x10] sm:$0xff] }
   0x2   :  { %v106_v3 = vmax.f32 %v8_v0, 0.0  ;;  %v107_v4 = vmax.f32 %v9_v1, 0.0  ;;  %v108_v5 = vmax.f32 %v10_v2, 0.0  ;;  %v11_v6 = vld [vmem:[%s904_s0 + $0x18] sm:$0xff]  ;;  %v12_v7 = vld [vmem:[%s904_s0 + $0x20] sm:$0xff]  ;;  %v13_v8 = vld [vmem:[%s904_s0 + $0x28] sm:$0xff] }
   0x3   :  { %v109_v9 = vmax.f32 %v11_v6, 0.0  ;;  %v110_v10 = vmax.f32 %v12_v7, 0.0  ;;  %v111_v11 = vmax.f32 %v13_v8, 0.0  ;;  %v14_v12 = vld [vmem:[%s904_s0 + $0x30] sm:$0xff]  ;;  %v15_v13 = vld [vmem:[%s904_s0 + $0x38] sm:$0xff]  ;;  %v16_v14 = vld [vmem:[%s904_s0 + $0x40] sm:$0xff] }
   0x4   :  { %204 = vst [vmem:[%s905_s1] sm:$0xff] %v106_v3  ;;  %205 = vst [vmem:[%s905_s1 + $0x8] sm:$0xff] %v107_v4  ;;  %v112_v15 = vmax.f32 %v14_v12, 0.0  ;;  %v113_v16 = vmax.f32 %v15_v13, 0.0  ;;  %v114_v17 = vmax.f32 %v16_v14, 0.0  ;;  %v17_v18 = vld [vmem:[%s904_s0 + $0x48] sm:$0xff]  ;;  %v18_v19 = vld [vmem:[%s904_s0 + $0x50] sm:$0xff] }
   0x5   :  { %206 = vst [vmem:[%s905_s1 + $0x10] sm:$0xff] %v108_v5  ;;  %v19_v20 = vld [vmem:[%s904_s0 + $0x58] sm:$0xff]  ;;  %207 = vst [vmem:[%s905_s1 + $0x18] sm:$0xff] %v109_v9  ;;  %v115_v21 = vmax.f32 %v17_v18, 0.0  ;;  %v116_v22 = vmax.f32 %v18_v19, 0.0  ;;  %v20_v24 = vld [vmem:[%s904_s0 + $0x60] sm:$0xff] }
   0x6   :  { %208 = vst [vmem:[%s905_s1 + $0x20] sm:$0xff] %v110_v10  ;;  %209 = vst [vmem:[%s905_s1 + $0x28] sm:$0xff] %v111_v11  ;;  %v117_v23 = vmax.f32 %v19_v20, 0.0  ;;  %v21_v25 = vld [vmem:[%s904_s0 + $0x68] sm:$0xff]  ;;  %v22_v26 = vld [vmem:[%s904_s0 + $0x70] sm:$0xff]  ;;  %v118_v27 = vmax.f32 %v20_v24, 0.0 }
   0x7   :  { %210 = vst [vmem:[%s905_s1 + $0x30] sm:$0xff] %v112_v15  ;;  %211 = vst [vmem:[%s905_s1 + $0x38] sm:$0xff] %v113_v16  ;;  %v119_v28 = vmax.f32 %v21_v25, 0.0  ;;  %v120_v29 = vmax.f32 %v22_v26, 0.0  ;;  %v23_v30 = vld [vmem:[%s904_s0 + $0x78] sm:$0xff]  ;;  %v24_v31 = vld [vmem:[%s904_s0 + $0x80] sm:$0xff] }
   0x8   :  { %212 = vst [vmem:[%s905_s1 + $0x40] sm:$0xff] %v114_v17  ;;  %v25_v32 = vld [vmem:[%s904_s0 + $0x88] sm:$0xff]  ;;  %213 = vst [vmem:[%s905_s1 + $0x48] sm:$0xff] %v115_v21  ;;  %v121_v33 = vmax.f32 %v23_v30, 0.0  ;;  %v122_v34 = vmax.f32 %v24_v31, 0.0  ;;  %v26_v36 = vld [vmem:[%s904_s0 + $0x90] sm:$0xff] }
   0x9   :  { %214 = vst [vmem:[%s905_s1 + $0x50] sm:$0xff] %v116_v22  ;;  %215 = vst [vmem:[%s905_s1 + $0x58] sm:$0xff] %v117_v23  ;;  %v123_v35 = vmax.f32 %v25_v32, 0.0  ;;  %v27_v37 = vld [vmem:[%s904_s0 + $0x98] sm:$0xff]  ;;  %v28_v38 = vld [vmem:[%s904_s0 + $0xa0] sm:$0xff]  ;;  %v124_v39 = vmax.f32 %v26_v36, 0.0 }
   0xa   :  { %216 = vst [vmem:[%s905_s1 + $0x60] sm:$0xff] %v118_v27  ;;  %217 = vst [vmem:[%s905_s1 + $0x68] sm:$0xff] %v119_v28  ;;  %v125_v40 = vmax.f32 %v27_v37, 0.0  ;;  %v126_v41 = vmax.f32 %v28_v38, 0.0  ;;  %v29_v42 = vld [vmem:[%s904_s0 + $0xa8] sm:$0xff]  ;;  %v30_v43 = vld [vmem:[%s904_s0 + $0xb0] sm:$0xff] }
   0xb   :  { %218 = vst [vmem:[%s905_s1 + $0x70] sm:$0xff] %v120_v29  ;;  %v31_v44 = vld [vmem:[%s904_s0 + $0xb8] sm:$0xff]  ;;  %219 = vst [vmem:[%s905_s1 + $0x78] sm:$0xff] %v121_v33  ;;  %v127_v45 = vmax.f32 %v29_v42, 0.0  ;;  %v128_v46 = vmax.f32 %v30_v43, 0.0  ;;  %v32_v48 = vld [vmem:[%s904_s0 + $0xc0] sm:$0xff] }
   0xc   :  { %220 = vst [vmem:[%s905_s1 + $0x80] sm:$0xff] %v122_v34  ;;  %221 = vst [vmem:[%s905_s1 + $0x88] sm:$0xff] %v123_v35  ;;  %v129_v47 = vmax.f32 %v31_v44, 0.0  ;;  %v33_v49 = vld [vmem:[%s904_s0 + $0xc8] sm:$0xff]  ;;  %v34_v50 = vld [vmem:[%s904_s0 + $0xd0] sm:$0xff]  ;;  %v130_v51 = vmax.f32 %v32_v48, 0.0 }
   0xd   :  { %222 = vst [vmem:[%s905_s1 + $0x90] sm:$0xff] %v124_v39  ;;  %223 = vst [vmem:[%s905_s1 + $0x98] sm:$0xff] %v125_v40  ;;  %v131_v52 = vmax.f32 %v33_v49, 0.0  ;;  %v132_v53 = vmax.f32 %v34_v50, 0.0  ;;  %v35_v54 = vld [vmem:[%s904_s0 + $0xd8] sm:$0xff]  ;;  %v36_v55 = vld [vmem:[%s904_s0 + $0xe0] sm:$0xff] }
   0xe   :  { %224 = vst [vmem:[%s905_s1 + $0xa0] sm:$0xff] %v126_v41  ;;  %v37_v56 = vld [vmem:[%s904_s0 + $0xe8] sm:$0xff]  ;;  %225 = vst [vmem:[%s905_s1 + $0xa8] sm:$0xff] %v127_v45  ;;  %v133_v57 = vmax.f32 %v35_v54, 0.0  ;;  %v134_v58 = vmax.f32 %v36_v55, 0.0  ;;  %v38_v60 = vld [vmem:[%s904_s0 + $0xf0] sm:$0xff] }
   0xf   :  { %226 = vst [vmem:[%s905_s1 + $0xb0] sm:$0xff] %v128_v46  ;;  %227 = vst [vmem:[%s905_s1 + $0xb8] sm:$0xff] %v129_v47  ;;  %v135_v59 = vmax.f32 %v37_v56, 0.0  ;;  %v39_v61 = vld [vmem:[%s904_s0 + $0xf8] sm:$0xff]  ;;  %v40_v62 = vld [vmem:[%s904_s0 + $0x100] sm:$0xff]  ;;  %v136_v63 = vmax.f32 %v38_v60, 0.0 }
  0x10   :  { %228 = vst [vmem:[%s905_s1 + $0xc0] sm:$0xff] %v130_v51  ;;  %229 = vst [vmem:[%s905_s1 + $0xc8] sm:$0xff] %v131_v52  ;;  %v137_v0 = vmax.f32 %v39_v61, 0.0  ;;  %v138_v1 = vmax.f32 %v40_v62, 0.0  ;;  %v41_v2 = vld [vmem:[%s904_s0 + $0x108] sm:$0xff]  ;;  %v42_v3 = vld [vmem:[%s904_s0 + $0x110] sm:$0xff] }
  0x11   :  { %230 = vst [vmem:[%s905_s1 + $0xd0] sm:$0xff] %v132_v53  ;;  %v43_v4 = vld [vmem:[%s904_s0 + $0x118] sm:$0xff]  ;;  %231 = vst [vmem:[%s905_s1 + $0xd8] sm:$0xff] %v133_v57  ;;  %v139_v5 = vmax.f32 %v41_v2, 0.0  ;;  %v140_v6 = vmax.f32 %v42_v3, 0.0  ;;  %v44_v8 = vld [vmem:[%s904_s0 + $0x120] sm:$0xff] }
  0x12   :  { %232 = vst [vmem:[%s905_s1 + $0xe0] sm:$0xff] %v134_v58  ;;  %233 = vst [vmem:[%s905_s1 + $0xe8] sm:$0xff] %v135_v59  ;;  %v141_v7 = vmax.f32 %v43_v4, 0.0  ;;  %v45_v9 = vld [vmem:[%s904_s0 + $0x128] sm:$0xff]  ;;  %v46_v10 = vld [vmem:[%s904_s0 + $0x130] sm:$0xff]  ;;  %v142_v11 = vmax.f32 %v44_v8, 0.0 }
  0x13   :  { %234 = vst [vmem:[%s905_s1 + $0xf0] sm:$0xff] %v136_v63  ;;  %235 = vst [vmem:[%s905_s1 + $0xf8] sm:$0xff] %v137_v0  ;;  %v143_v12 = vmax.f32 %v45_v9, 0.0  ;;  %v144_v13 = vmax.f32 %v46_v10, 0.0  ;;  %v47_v14 = vld [vmem:[%s904_s0 + $0x138] sm:$0xff]  ;;  %v48_v15 = vld [vmem:[%s904_s0 + $0x140] sm:$0xff] }
  0x14   :  { %236 = vst [vmem:[%s905_s1 + $0x100] sm:$0xff] %v138_v1  ;;  %v49_v16 = vld [vmem:[%s904_s0 + $0x148] sm:$0xff]  ;;  %237 = vst [vmem:[%s905_s1 + $0x108] sm:$0xff] %v139_v5  ;;  %v145_v17 = vmax.f32 %v47_v14, 0.0  ;;  %v146_v18 = vmax.f32 %v48_v15, 0.0  ;;  %v50_v20 = vld [vmem:[%s904_s0 + $0x150] sm:$0xff] }
  0x15   :  { %238 = vst [vmem:[%s905_s1 + $0x110] sm:$0xff] %v140_v6  ;;  %239 = vst [vmem:[%s905_s1 + $0x118] sm:$0xff] %v141_v7  ;;  %v147_v19 = vmax.f32 %v49_v16, 0.0  ;;  %v51_v21 = vld [vmem:[%s904_s0 + $0x158] sm:$0xff]  ;;  %v52_v22 = vld [vmem:[%s904_s0 + $0x160] sm:$0xff]  ;;  %v148_v23 = vmax.f32 %v50_v20, 0.0 }
  0x16   :  { %240 = vst [vmem:[%s905_s1 + $0x120] sm:$0xff] %v142_v11  ;;  %241 = vst [vmem:[%s905_s1 + $0x128] sm:$0xff] %v143_v12  ;;  %v149_v24 = vmax.f32 %v51_v21, 0.0  ;;  %v150_v25 = vmax.f32 %v52_v22, 0.0  ;;  %v53_v26 = vld [vmem:[%s904_s0 + $0x168] sm:$0xff]  ;;  %v54_v27 = vld [vmem:[%s904_s0 + $0x170] sm:$0xff] }
  0x17   :  { %242 = vst [vmem:[%s905_s1 + $0x130] sm:$0xff] %v144_v13  ;;  %v55_v28 = vld [vmem:[%s904_s0 + $0x178] sm:$0xff]  ;;  %243 = vst [vmem:[%s905_s1 + $0x138] sm:$0xff] %v145_v17  ;;  %v151_v29 = vmax.f32 %v53_v26, 0.0  ;;  %v152_v30 = vmax.f32 %v54_v27, 0.0  ;;  %v56_v32 = vld [vmem:[%s904_s0 + $0x180] sm:$0xff] }
  0x18   :  { %244 = vst [vmem:[%s905_s1 + $0x140] sm:$0xff] %v146_v18  ;;  %245 = vst [vmem:[%s905_s1 + $0x148] sm:$0xff] %v147_v19  ;;  %v153_v31 = vmax.f32 %v55_v28, 0.0  ;;  %v57_v33 = vld [vmem:[%s904_s0 + $0x188] sm:$0xff]  ;;  %v58_v34 = vld [vmem:[%s904_s0 + $0x190] sm:$0xff]  ;;  %v154_v35 = vmax.f32 %v56_v32, 0.0 }
  0x19   :  { %246 = vst [vmem:[%s905_s1 + $0x150] sm:$0xff] %v148_v23  ;;  %247 = vst [vmem:[%s905_s1 + $0x158] sm:$0xff] %v149_v24  ;;  %v155_v36 = vmax.f32 %v57_v33, 0.0  ;;  %v156_v37 = vmax.f32 %v58_v34, 0.0  ;;  %v59_v38 = vld [vmem:[%s904_s0 + $0x198] sm:$0xff]  ;;  %v60_v39 = vld [vmem:[%s904_s0 + $0x1a0] sm:$0xff] }
  0x1a   :  { %248 = vst [vmem:[%s905_s1 + $0x160] sm:$0xff] %v150_v25  ;;  %v61_v40 = vld [vmem:[%s904_s0 + $0x1a8] sm:$0xff]  ;;  %249 = vst [vmem:[%s905_s1 + $0x168] sm:$0xff] %v151_v29  ;;  %v157_v41 = vmax.f32 %v59_v38, 0.0  ;;  %v158_v42 = vmax.f32 %v60_v39, 0.0  ;;  %v62_v44 = vld [vmem:[%s904_s0 + $0x1b0] sm:$0xff] }
  0x1b   :  { %250 = vst [vmem:[%s905_s1 + $0x170] sm:$0xff] %v152_v30  ;;  %251 = vst [vmem:[%s905_s1 + $0x178] sm:$0xff] %v153_v31  ;;  %v159_v43 = vmax.f32 %v61_v40, 0.0  ;;  %v63_v45 = vld [vmem:[%s904_s0 + $0x1b8] sm:$0xff]  ;;  %v64_v46 = vld [vmem:[%s904_s0 + $0x1c0] sm:$0xff]  ;;  %v160_v47 = vmax.f32 %v62_v44, 0.0 }
  0x1c   :  { %252 = vst [vmem:[%s905_s1 + $0x180] sm:$0xff] %v154_v35  ;;  %253 = vst [vmem:[%s905_s1 + $0x188] sm:$0xff] %v155_v36  ;;  %v161_v48 = vmax.f32 %v63_v45, 0.0  ;;  %v162_v49 = vmax.f32 %v64_v46, 0.0  ;;  %v65_v50 = vld [vmem:[%s904_s0 + $0x1c8] sm:$0xff]  ;;  %v66_v51 = vld [vmem:[%s904_s0 + $0x1d0] sm:$0xff] }
  0x1d   :  { %254 = vst [vmem:[%s905_s1 + $0x190] sm:$0xff] %v156_v37  ;;  %v67_v52 = vld [vmem:[%s904_s0 + $0x1d8] sm:$0xff]  ;;  %255 = vst [vmem:[%s905_s1 + $0x198] sm:$0xff] %v157_v41  ;;  %v163_v53 = vmax.f32 %v65_v50, 0.0  ;;  %v164_v54 = vmax.f32 %v66_v51, 0.0  ;;  %v68_v56 = vld [vmem:[%s904_s0 + $0x1e0] sm:$0xff] }
  0x1e   :  { %256 = vst [vmem:[%s905_s1 + $0x1a0] sm:$0xff] %v158_v42  ;;  %257 = vst [vmem:[%s905_s1 + $0x1a8] sm:$0xff] %v159_v43  ;;  %v165_v55 = vmax.f32 %v67_v52, 0.0  ;;  %v69_v57 = vld [vmem:[%s904_s0 + $0x1e8] sm:$0xff]  ;;  %v70_v58 = vld [vmem:[%s904_s0 + $0x1f0] sm:$0xff]  ;;  %v166_v59 = vmax.f32 %v68_v56, 0.0 }
  0x1f   :  { %258 = vst [vmem:[%s905_s1 + $0x1b0] sm:$0xff] %v160_v47  ;;  %259 = vst [vmem:[%s905_s1 + $0x1b8] sm:$0xff] %v161_v48  ;;  %v167_v60 = vmax.f32 %v69_v57, 0.0  ;;  %v168_v61 = vmax.f32 %v70_v58, 0.0  ;;  %v71_v62 = vld [vmem:[%s904_s0 + $0x1f8] sm:$0xff]  ;;  %v72_v63 = vld [vmem:[%s904_s0 + $0x200] sm:$0xff] }
  0x20   :  { %260 = vst [vmem:[%s905_s1 + $0x1c0] sm:$0xff] %v162_v49  ;;  %v73_v0 = vld [vmem:[%s904_s0 + $0x208] sm:$0xff]  ;;  %261 = vst [vmem:[%s905_s1 + $0x1c8] sm:$0xff] %v163_v53  ;;  %v169_v1 = vmax.f32 %v71_v62, 0.0  ;;  %v170_v2 = vmax.f32 %v72_v63, 0.0  ;;  %v74_v4 = vld [vmem:[%s904_s0 + $0x210] sm:$0xff] }
  0x21   :  { %262 = vst [vmem:[%s905_s1 + $0x1d0] sm:$0xff] %v164_v54  ;;  %263 = vst [vmem:[%s905_s1 + $0x1d8] sm:$0xff] %v165_v55  ;;  %v171_v3 = vmax.f32 %v73_v0, 0.0  ;;  %v75_v5 = vld [vmem:[%s904_s0 + $0x218] sm:$0xff]  ;;  %v76_v6 = vld [vmem:[%s904_s0 + $0x220] sm:$0xff]  ;;  %v172_v7 = vmax.f32 %v74_v4, 0.0 }
  0x22   :  { %264 = vst [vmem:[%s905_s1 + $0x1e0] sm:$0xff] %v166_v59  ;;  %265 = vst [vmem:[%s905_s1 + $0x1e8] sm:$0xff] %v167_v60  ;;  %v173_v8 = vmax.f32 %v75_v5, 0.0  ;;  %v174_v9 = vmax.f32 %v76_v6, 0.0  ;;  %v77_v10 = vld [vmem:[%s904_s0 + $0x228] sm:$0xff]  ;;  %v78_v11 = vld [vmem:[%s904_s0 + $0x230] sm:$0xff] }
  0x23   :  { %266 = vst [vmem:[%s905_s1 + $0x1f0] sm:$0xff] %v168_v61  ;;  %v79_v12 = vld [vmem:[%s904_s0 + $0x238] sm:$0xff]  ;;  %267 = vst [vmem:[%s905_s1 + $0x1f8] sm:$0xff] %v169_v1  ;;  %v175_v13 = vmax.f32 %v77_v10, 0.0  ;;  %v176_v14 = vmax.f32 %v78_v11, 0.0  ;;  %v80_v16 = vld [vmem:[%s904_s0 + $0x240] sm:$0xff] }
  0x24   :  { %268 = vst [vmem:[%s905_s1 + $0x200] sm:$0xff] %v170_v2  ;;  %269 = vst [vmem:[%s905_s1 + $0x208] sm:$0xff] %v171_v3  ;;  %v177_v15 = vmax.f32 %v79_v12, 0.0  ;;  %v81_v17 = vld [vmem:[%s904_s0 + $0x248] sm:$0xff]  ;;  %v82_v18 = vld [vmem:[%s904_s0 + $0x250] sm:$0xff]  ;;  %v178_v19 = vmax.f32 %v80_v16, 0.0 }
  0x25   :  { %270 = vst [vmem:[%s905_s1 + $0x210] sm:$0xff] %v172_v7  ;;  %271 = vst [vmem:[%s905_s1 + $0x218] sm:$0xff] %v173_v8  ;;  %v179_v20 = vmax.f32 %v81_v17, 0.0  ;;  %v180_v21 = vmax.f32 %v82_v18, 0.0  ;;  %v83_v22 = vld [vmem:[%s904_s0 + $0x258] sm:$0xff]  ;;  %v84_v23 = vld [vmem:[%s904_s0 + $0x260] sm:$0xff] }
  0x26   :  { %272 = vst [vmem:[%s905_s1 + $0x220] sm:$0xff] %v174_v9  ;;  %v85_v24 = vld [vmem:[%s904_s0 + $0x268] sm:$0xff]  ;;  %273 = vst [vmem:[%s905_s1 + $0x228] sm:$0xff] %v175_v13  ;;  %v181_v25 = vmax.f32 %v83_v22, 0.0  ;;  %v182_v26 = vmax.f32 %v84_v23, 0.0  ;;  %v86_v28 = vld [vmem:[%s904_s0 + $0x270] sm:$0xff] }
  0x27   :  { %274 = vst [vmem:[%s905_s1 + $0x230] sm:$0xff] %v176_v14  ;;  %275 = vst [vmem:[%s905_s1 + $0x238] sm:$0xff] %v177_v15  ;;  %v183_v27 = vmax.f32 %v85_v24, 0.0  ;;  %v87_v29 = vld [vmem:[%s904_s0 + $0x278] sm:$0xff]  ;;  %v88_v30 = vld [vmem:[%s904_s0 + $0x280] sm:$0xff]  ;;  %v184_v31 = vmax.f32 %v86_v28, 0.0 }
  0x28   :  { %276 = vst [vmem:[%s905_s1 + $0x240] sm:$0xff] %v178_v19  ;;  %277 = vst [vmem:[%s905_s1 + $0x248] sm:$0xff] %v179_v20  ;;  %v185_v32 = vmax.f32 %v87_v29, 0.0  ;;  %v186_v33 = vmax.f32 %v88_v30, 0.0  ;;  %v89_v34 = vld [vmem:[%s904_s0 + $0x288] sm:$0xff]  ;;  %v90_v35 = vld [vmem:[%s904_s0 + $0x290] sm:$0xff] }
  0x29   :  { %278 = vst [vmem:[%s905_s1 + $0x250] sm:$0xff] %v180_v21  ;;  %v91_v36 = vld [vmem:[%s904_s0 + $0x298] sm:$0xff]  ;;  %279 = vst [vmem:[%s905_s1 + $0x258] sm:$0xff] %v181_v25  ;;  %v187_v37 = vmax.f32 %v89_v34, 0.0  ;;  %v188_v38 = vmax.f32 %v90_v35, 0.0  ;;  %v92_v40 = vld [vmem:[%s904_s0 + $0x2a0] sm:$0xff] }
  0x2a   :  { %280 = vst [vmem:[%s905_s1 + $0x260] sm:$0xff] %v182_v26  ;;  %281 = vst [vmem:[%s905_s1 + $0x268] sm:$0xff] %v183_v27  ;;  %v189_v39 = vmax.f32 %v91_v36, 0.0  ;;  %v93_v41 = vld [vmem:[%s904_s0 + $0x2a8] sm:$0xff]  ;;  %v94_v42 = vld [vmem:[%s904_s0 + $0x2b0] sm:$0xff]  ;;  %v190_v43 = vmax.f32 %v92_v40, 0.0 }
  0x2b   :  { %282 = vst [vmem:[%s905_s1 + $0x270] sm:$0xff] %v184_v31  ;;  %283 = vst [vmem:[%s905_s1 + $0x278] sm:$0xff] %v185_v32  ;;  %v191_v44 = vmax.f32 %v93_v41, 0.0  ;;  %v192_v45 = vmax.f32 %v94_v42, 0.0  ;;  %v95_v46 = vld [vmem:[%s904_s0 + $0x2b8] sm:$0xff]  ;;  %v96_v47 = vld [vmem:[%s904_s0 + $0x2c0] sm:$0xff] }
  0x2c   :  { %284 = vst [vmem:[%s905_s1 + $0x280] sm:$0xff] %v186_v33  ;;  %v97_v48 = vld [vmem:[%s904_s0 + $0x2c8] sm:$0xff]  ;;  %285 = vst [vmem:[%s905_s1 + $0x288] sm:$0xff] %v187_v37  ;;  %v193_v49 = vmax.f32 %v95_v46, 0.0  ;;  %v194_v50 = vmax.f32 %v96_v47, 0.0  ;;  %v98_v52 = vld [vmem:[%s904_s0 + $0x2d0] sm:$0xff] }
  0x2d   :  { %286 = vst [vmem:[%s905_s1 + $0x290] sm:$0xff] %v188_v38  ;;  %287 = vst [vmem:[%s905_s1 + $0x298] sm:$0xff] %v189_v39  ;;  %v195_v51 = vmax.f32 %v97_v48, 0.0  ;;  %v99_v53 = vld [vmem:[%s904_s0 + $0x2d8] sm:$0xff]  ;;  %v100_v54 = vld [vmem:[%s904_s0 + $0x2e0] sm:$0xff]  ;;  %v196_v55 = vmax.f32 %v98_v52, 0.0 }
  0x2e   :  { %288 = vst [vmem:[%s905_s1 + $0x2a0] sm:$0xff] %v190_v43  ;;  %289 = vst [vmem:[%s905_s1 + $0x2a8] sm:$0xff] %v191_v44  ;;  %v197_v56 = vmax.f32 %v99_v53, 0.0  ;;  %v198_v57 = vmax.f32 %v100_v54, 0.0  ;;  %v101_v58 = vld [vmem:[%s904_s0 + $0x2e8] sm:$0xff]  ;;  %v102_v59 = vld [vmem:[%s904_s0 + $0x2f0] sm:$0xff] }
  0x2f   :  { %290 = vst [vmem:[%s905_s1 + $0x2b0] sm:$0xff] %v192_v45  ;;  %v103_v60 = vld [vmem:[%s904_s0 + $0x2f8] sm:$0xff]  ;;  %291 = vst [vmem:[%s905_s1 + $0x2b8] sm:$0xff] %v193_v49  ;;  %v199_v61 = vmax.f32 %v101_v58, 0.0  ;;  %v200_v62 = vmax.f32 %v102_v59, 0.0  ;;  %v104_v0 = vld [vmem:[%s904_s0 + $0x300] sm:$0xff] }
  0x30   :  { %292 = vst [vmem:[%s905_s1 + $0x2c0] sm:$0xff] %v194_v50  ;;  %293 = vst [vmem:[%s905_s1 + $0x2c8] sm:$0xff] %v195_v51  ;;  %v201_v63 = vmax.f32 %v103_v60, 0.0  ;;  %v105_v1 = vld [vmem:[%s904_s0 + $0x308] sm:$0xff]  ;;  %v202_v2 = vmax.f32 %v104_v0, 0.0 }
  0x31   :  { %294 = vst [vmem:[%s905_s1 + $0x2d0] sm:$0xff] %v196_v55  ;;  %295 = vst [vmem:[%s905_s1 + $0x2d8] sm:$0xff] %v197_v56  ;;  %v203_v3 = vmax.f32 %v105_v1, 0.0 }
  0x32   :  { %296 = vst [vmem:[%s905_s1 + $0x2e0] sm:$0xff] %v198_v57  ;;  %297 = vst [vmem:[%s905_s1 + $0x2e8] sm:$0xff] %v199_v61 }
  0x33   :  { %298 = vst [vmem:[%s905_s1 + $0x2f0] sm:$0xff] %v200_v62  ;;  %299 = vst [vmem:[%s905_s1 + $0x2f8] sm:$0xff] %v201_v63 }
  0x34   :  { %300 = vst [vmem:[%s905_s1 + $0x300] sm:$0xff] %v202_v2  ;;  %301 = vst [vmem:[%s905_s1 + $0x308] sm:$0xff] %v203_v3 }

</bundles_post_ra>
